<compile_context>
chip_gen: v7x
topology: tpu7x:2x2x1
jax: 0.10.0
libtpu: 0.0.40
codegen_flags: <defaults>
</compile_context>

<pallas_src>
import functools

import numpy as np
import jax
import jax.numpy as jnp
from jax.experimental import pallas as pl
from jax.experimental.pallas import tpu as pltpu


# ---------------------------------------------------------------------------
# Bicubic interpolation matrices (host glue, cached).
# PyTorch bicubic kernel (a = -0.75), align_corners=False, replicate borders.
# ---------------------------------------------------------------------------
_A = -0.75


def _cubic1(x):  # |x| in [0, 1]
    return ((_A + 2.0) * x - (_A + 3.0)) * x * x + 1.0


def _cubic2(x):  # |x| in [1, 2]
    return ((_A * x - 5.0 * _A) * x + 8.0 * _A) * x - 4.0 * _A


@functools.lru_cache(maxsize=None)
def bicubic_matrix(out_size: int, in_size: int):
    """Dense (out_size, in_size) matrix reproducing one axis of
    F.interpolate(mode='bicubic', align_corners=False) with clamped borders."""
    scale = in_size / out_size
    mat = np.zeros((out_size, in_size), dtype=np.float64)
    for o in range(out_size):
        x = (o + 0.5) * scale - 0.5
        x0 = int(np.floor(x))
        t = x - x0
        taps = (_cubic2(t + 1.0), _cubic1(t), _cubic1(1.0 - t), _cubic2(2.0 - t))
        for k, w in enumerate(taps):
            idx = min(max(x0 - 1 + k, 0), in_size - 1)
            mat[o, idx] += w
    return mat.astype(np.float32)


# ---------------------------------------------------------------------------
# Tile selection: lane-dense spatial tile (multiple of 128 dividing H*W, or the
# full extent), channel tile a multiple of 8 (or full C).  Per-input block is
# capped at ~1 MiB f32 so 2x double-buffering of 3 inputs + the block-shaped
# accumulator stays far below the 32 MiB scoped-VMEM limit we request.
# ---------------------------------------------------------------------------
_LANE_TILE_CAP = 4096          # elements along flattened H*W (lane) axis
_BLOCK_ELEMS_CAP = 1 << 18     # 256K f32 elements = 1 MiB per input block


def _choose_tiles(C, HW):
    # Lane tile: largest multiple of 128 dividing HW, up to the cap.
    if HW % 128 == 0:
        thw = 128
        k = 128
        cap = min(HW, _LANE_TILE_CAP)
        while k <= cap:
            if HW % k == 0:
                thw = k
            k += 128
    else:
        thw = HW  # full extent — always a legal block dim
    # Channel tile.
    max_tc = max(1, _BLOCK_ELEMS_CAP // thw)
    if C <= max_tc:
        tc = C
    else:
        tc = C  # fallback: full extent (always legal)
        d = (max_tc // 8) * 8
        while d >= 8:
            if C % d == 0:
                tc = d
                break
            d -= 8
    return tc, thw


# ---------------------------------------------------------------------------
# Pallas kernels.
#   grid = (N, C // TC, HW // THW); axes 1 and 2 are reduction ("arbitrary"),
#   axis 0 ("parallel") owns a distinct (1, 1, 128) output block per batch elem.
#   acc_ref is a block-shaped f32 VMEM scratch: each step is pure VPU adds, the
#   single cross-lane reduce happens only at the final reduction step.
# ---------------------------------------------------------------------------
def _attn_loss_kernel(map_ref, tex_ref, soft_ref, out_ref, acc_ref, *, criterion):
    c = pl.program_id(1)
    s = pl.program_id(2)

    @pl.when(jnp.logical_and(c == 0, s == 0))
    def _init():
        acc_ref[...] = jnp.zeros_like(acc_ref)

    d = (map_ref[0] - tex_ref[0]) * soft_ref[0]           # (TC, THW)
    acc_ref[...] += (d * d) if criterion == "mse" else jnp.abs(d)

    @pl.when(jnp.logical_and(c == pl.num_programs(1) - 1,
                             s == pl.num_programs(2) - 1))
    def _finalize():
        out_ref[...] = jnp.broadcast_to(jnp.sum(acc_ref[...]), out_ref.shape)


def _plain_loss_kernel(map_ref, tex_ref, out_ref, acc_ref, *, criterion):
    c = pl.program_id(1)
    s = pl.program_id(2)

    @pl.when(jnp.logical_and(c == 0, s == 0))
    def _init():
        acc_ref[...] = jnp.zeros_like(acc_ref)

    d = map_ref[0] - tex_ref[0]                           # (TC, THW)
    acc_ref[...] += (d * d) if criterion == "mse" else jnp.abs(d)

    @pl.when(jnp.logical_and(c == pl.num_programs(1) - 1,
                             s == pl.num_programs(2) - 1))
    def _finalize():
        out_ref[...] = jnp.broadcast_to(jnp.sum(acc_ref[...]), out_ref.shape)


# ---------------------------------------------------------------------------
# Per-level wrapper: returns the level's SUM of penalties (scalar f32).
# ---------------------------------------------------------------------------
def _level_loss_sum(map_i, tex_i, soft_flat, *, criterion):
    N, C, H, W = map_i.shape
    HW = H * W

    # Lane-dense flattening + f32 boundary cast (no per-element casts in-kernel).
    m = map_i.reshape(N, C, HW).astype(jnp.float32)
    t = tex_i.reshape(N, C, HW).astype(jnp.float32)

    TC, THW = _choose_tiles(C, HW)
    grid = (N, C // TC, HW // THW)

    map_spec = pl.BlockSpec((1, TC, THW), lambda n, c, s: (n, c, s))
    out_spec = pl.BlockSpec((1, 1, 128), lambda n, c, s: (n, 0, 0))

    if soft_flat is None:
        kernel = functools.partial(_plain_loss_kernel, criterion=criterion)
        in_specs = [map_spec, map_spec]
        args = (m, t)
    else:
        soft_spec = pl.BlockSpec((1, 1, THW), lambda n, c, s: (n, 0, s))
        kernel = functools.partial(_attn_loss_kernel, criterion=criterion)
        in_specs = [map_spec, map_spec, soft_spec]
        args = (m, t, soft_flat.astype(jnp.float32))

    partials = pl.pallas_call(
        kernel,
        out_shape=jax.ShapeDtypeStruct((N, 1, 128), jnp.float32),
        grid=grid,
        in_specs=in_specs,
        out_specs=out_spec,
        scratch_shapes=[pltpu.VMEM((TC, THW), jnp.float32)],
        compiler_params=pltpu.CompilerParams(
            dimension_semantics=("parallel", "arbitrary", "arbitrary"),
            vmem_limit_bytes=32 * 1024 * 1024),
    )(*args)

    return jnp.sum(partials[:, 0, 0])


# ---------------------------------------------------------------------------
# Full forward (matches TransferalPerceptualLoss.forward).
# ---------------------------------------------------------------------------
def transferal_perceptual_loss(maps, soft_attention, textures, *,
                               loss_weight=1.0, use_attention=True,
                               criterion="mse"):
    criterion = criterion.lower()
    if criterion not in ("l1", "mse"):
        raise ValueError(f"criterion should be 'l1' or 'mse', but got {criterion}")

    loss_texture = jnp.float32(0.0)
    if use_attention:
        n, _, h, w = soft_attention.shape
        soft_f32 = soft_attention.astype(jnp.float32)
        for i, (m, t) in enumerate(zip(maps, textures)):
            hi, wi = m.shape[-2], m.shape[-1]
            if i == 0:
                soft_i = jax.nn.sigmoid(soft_f32)                       # (N,1,H,W)
            else:
                # Tiny O(N*Hi*Wi) bicubic upsample, hoisted out of the Pallas
                # reduction (per perf review) and computed in exact f32.
                wrow = jnp.asarray(bicubic_matrix(hi, h))               # (Hi, H)
                wcolt = jnp.asarray(bicubic_matrix(wi, w).T)            # (W, Wi)
                soft_i = jnp.einsum(
                    "hk,nkw,wl->nhl", wrow, soft_f32[:, 0], wcolt,
                    precision=jax.lax.Precision.HIGHEST)                # (N,Hi,Wi)
            soft_flat = soft_i.reshape(n, 1, hi * wi)
            s = _level_loss_sum(m, t, soft_flat, criterion=criterion)
            loss_texture = loss_texture + s / float(np.prod(m.shape))   # mean
    else:
        for m, t in zip(maps, textures):
            s = _level_loss_sum(m, t, None, criterion=criterion)
            loss_texture = loss_texture + s / float(np.prod(m.shape))

    return loss_texture * loss_weight


# ---------------------------------------------------------------------------
if __name__ == "__main__":
    key = jax.random.PRNGKey(0)
    keys = jax.random.split(key, 7)
    N, C, H, W = 2, 4, 8, 8

    maps = tuple(
        jax.random.normal(keys[i], (N, C, H * 2 ** i, W * 2 ** i), jnp.float32)
        for i in range(3))
    textures = tuple(
        jax.random.normal(keys[3 + i], (N, C, H * 2 ** i, W * 2 ** i), jnp.float32)
        for i in range(3))
    soft_attention = jax.random.normal(keys[6], (N, 1, H, W), jnp.float32)

    loss_fn = jax.jit(functools.partial(
        transferal_perceptual_loss,
        loss_weight=1.0, use_attention=True, criterion="mse"))

    loss = loss_fn(maps, soft_attention, textures)
    jax.block_until_ready(loss)
    print("KERNEL_OK")
</pallas_src>

<mosaic_0001>
module attributes {stable_mosaic.version = 11 : i64} {
  func.func @_attn_loss_kernel(%arg0: i32, %arg1: i32, %arg2: i32, %arg3: memref<1x4x1024xf32, #tpu.memory_space<vmem>>, %arg4: memref<1x4x1024xf32, #tpu.memory_space<vmem>>, %arg5: memref<1x1x1024xf32, #tpu.memory_space<vmem>>, %arg6: memref<1x1x128xf32, #tpu.memory_space<vmem>>, %arg7: memref<4x1024xf32, #tpu.memory_space<vmem>>) attributes {dimension_semantics = [#tpu.dimension_semantics<parallel>, #tpu.dimension_semantics<arbitrary>, #tpu.dimension_semantics<arbitrary>], iteration_bounds = array<i64: 2, 1, 1>, scalar_prefetch = 0 : i64, scratch_operands = 1 : i64, tpu.core_type = #tpu.core_type<tc>, window_params = [{transform_indices = @transform_0, window_bounds = array<i64: 1, 4, 1024>}, {transform_indices = @transform_1, window_bounds = array<i64: 1, 4, 1024>}, {transform_indices = @transform_2, window_bounds = array<i64: 1, 1, 1024>}, {transform_indices = @transform_3, window_bounds = array<i64: 1, 1, 128>}]} {
    %c0_i32 = arith.constant 0 : i32
    %0 = arith.cmpi eq, %arg1, %c0_i32 : i32
    %c0_i32_0 = arith.constant 0 : i32
    %1 = arith.cmpi eq, %arg2, %c0_i32_0 : i32
    %2 = arith.andi %0, %1 : i1
    %3 = arith.extui %2 : i1 to i32
    %c0_i32_1 = arith.constant 0 : i32
    %4 = arith.cmpi ne, %3, %c0_i32_1 : i32
    scf.if %4 {
      %cst = arith.constant 0.000000e+00 : f32
      %23 = vector.broadcast %cst : f32 to vector<4x1024xf32>
      %c0_17 = arith.constant 0 : index
      %c0_18 = arith.constant 0 : index
      %24 = vector.load %arg7[%c0_17, %c0_18] : memref<4x1024xf32, #tpu.memory_space<vmem>>, vector<4x1024xf32>
      tpu.vector_store %arg7[%c0_17, %c0_18], %23 {strides = array<i32>} : memref<4x1024xf32, #tpu.memory_space<vmem>>, vector<4x1024xf32>,
    } else {
    }
    %c0 = arith.constant 0 : index
    %c0_2 = arith.constant 0 : index
    %c0_3 = arith.constant 0 : index
    %5 = vector.load %arg3[%c0, %c0_2, %c0_3] : memref<1x4x1024xf32, #tpu.memory_space<vmem>>, vector<1x4x1024xf32>
    %6 = vector.shape_cast %5 : vector<1x4x1024xf32> to vector<4x1024xf32>
    %c0_4 = arith.constant 0 : index
    %c0_5 = arith.constant 0 : index
    %c0_6 = arith.constant 0 : index
    %7 = vector.load %arg4[%c0_4, %c0_5, %c0_6] : memref<1x4x1024xf32, #tpu.memory_space<vmem>>, vector<1x4x1024xf32>
    %8 = vector.shape_cast %7 : vector<1x4x1024xf32> to vector<4x1024xf32>
    %9 = arith.subf %6, %8 : vector<4x1024xf32>
    %c0_7 = arith.constant 0 : index
    %c0_8 = arith.constant 0 : index
    %c0_9 = arith.constant 0 : index
    %10 = vector.load %arg5[%c0_7, %c0_8, %c0_9] : memref<1x1x1024xf32, #tpu.memory_space<vmem>>, vector<1x1x1024xf32>
    %11 = vector.shape_cast %10 : vector<1x1x1024xf32> to vector<1x1024xf32>
    %12 = vector.broadcast %11 : vector<1x1024xf32> to vector<4x1024xf32>
    %13 = arith.mulf %9, %12 : vector<4x1024xf32>
    %c0_10 = arith.constant 0 : index
    %c0_11 = arith.constant 0 : index
    %14 = vector.load %arg7[%c0_10, %c0_11] : memref<4x1024xf32, #tpu.memory_space<vmem>>, vector<4x1024xf32>
    %15 = arith.mulf %13, %13 : vector<4x1024xf32>
    %16 = arith.addf %14, %15 : vector<4x1024xf32>
    %c0_12 = arith.constant 0 : index
    %c0_13 = arith.constant 0 : index
    %17 = vector.load %arg7[%c0_12, %c0_13] : memref<4x1024xf32, #tpu.memory_space<vmem>>, vector<4x1024xf32>
    tpu.vector_store %arg7[%c0_12, %c0_13], %16 {strides = array<i32>} : memref<4x1024xf32, #tpu.memory_space<vmem>>, vector<4x1024xf32>,
    %c0_i32_14 = arith.constant 0 : i32
    %18 = arith.cmpi eq, %arg1, %c0_i32_14 : i32
    %c0_i32_15 = arith.constant 0 : i32
    %19 = arith.cmpi eq, %arg2, %c0_i32_15 : i32
    %20 = arith.andi %18, %19 : i1
    %21 = arith.extui %20 : i1 to i32
    %c0_i32_16 = arith.constant 0 : i32
    %22 = arith.cmpi ne, %21, %c0_i32_16 : i32
    scf.if %22 {
      %c0_17 = arith.constant 0 : index
      %c0_18 = arith.constant 0 : index
      %23 = vector.load %arg7[%c0_17, %c0_18] : memref<4x1024xf32, #tpu.memory_space<vmem>>, vector<4x1024xf32>
      %24 = vector.shape_cast %23 : vector<4x1024xf32> to vector<1x4x1024xf32>
      %cst = arith.constant dense<0.000000e+00> : vector<1xf32>
      %25 = vector.multi_reduction <add>, %24, %cst [1, 2] : vector<1x4x1024xf32> to vector<1xf32>
      %26 = vector.shape_cast %25 : vector<1xf32> to vector<1x1x1xf32>
      %27 = vector.extract %26[0, 0, 0] : f32 from vector<1x1x1xf32>
      %28 = vector.broadcast %27 : f32 to vector<1x1x128xf32>
      %c0_19 = arith.constant 0 : index
      %c0_20 = arith.constant 0 : index
      %c0_21 = arith.constant 0 : index
      %29 = vector.load %arg6[%c0_19, %c0_20, %c0_21] : memref<1x1x128xf32, #tpu.memory_space<vmem>>, vector<1x1x128xf32>
      tpu.vector_store %arg6[%c0_19, %c0_20, %c0_21], %28 {strides = array<i32>} : memref<1x1x128xf32, #tpu.memory_space<vmem>>, vector<1x1x128xf32>,
    } else {
    }
    return
  }
  func.func @transform_0(%arg0: i32, %arg1: i32, %arg2: i32) -> (i32, i32, i32) {
    %c0_i32 = arith.constant 0 : i32
    return %arg0, %arg1, %arg2 : i32, i32, i32
  }
  func.func @transform_1(%arg0: i32, %arg1: i32, %arg2: i32) -> (i32, i32, i32) {
    %c0_i32 = arith.constant 0 : i32
    return %arg0, %arg1, %arg2 : i32, i32, i32
  }
  func.func @transform_2(%arg0: i32, %arg1: i32, %arg2: i32) -> (i32, i32, i32) {
    %c0_i32 = arith.constant 0 : i32
    %c0_i32_0 = arith.constant 0 : i32
    return %arg0, %c0_i32, %arg2 : i32, i32, i32
  }
  func.func @transform_3(%arg0: i32, %arg1: i32, %arg2: i32) -> (i32, i32, i32) {
    %c0_i32 = arith.constant 0 : i32
    %c0_i32_0 = arith.constant 0 : i32
    %c0_i32_1 = arith.constant 0 : i32
    return %arg0, %c0_i32, %c0_i32_0 : i32, i32, i32
  }
}

module attributes {stable_mosaic.version = 11 : i64} {
  func.func @_attn_loss_kernel(%arg0: i32, %arg1: i32, %arg2: i32, %arg3: memref<1x4x256xf32, #tpu.memory_space<vmem>>, %arg4: memref<1x4x256xf32, #tpu.memory_space<vmem>>, %arg5: memref<1x1x256xf32, #tpu.memory_space<vmem>>, %arg6: memref<1x1x128xf32, #tpu.memory_space<vmem>>, %arg7: memref<4x256xf32, #tpu.memory_space<vmem>>) attributes {dimension_semantics = [#tpu.dimension_semantics<parallel>, #tpu.dimension_semantics<arbitrary>, #tpu.dimension_semantics<arbitrary>], iteration_bounds = array<i64: 2, 1, 1>, scalar_prefetch = 0 : i64, scratch_operands = 1 : i64, tpu.core_type = #tpu.core_type<tc>, window_params = [{transform_indices = @transform_0, window_bounds = array<i64: 1, 4, 256>}, {transform_indices = @transform_1, window_bounds = array<i64: 1, 4, 256>}, {transform_indices = @transform_2, window_bounds = array<i64: 1, 1, 256>}, {transform_indices = @transform_3, window_bounds = array<i64: 1, 1, 128>}]} {
    %c0_i32 = arith.constant 0 : i32
    %0 = arith.cmpi eq, %arg1, %c0_i32 : i32
    %c0_i32_0 = arith.constant 0 : i32
    %1 = arith.cmpi eq, %arg2, %c0_i32_0 : i32
    %2 = arith.andi %0, %1 : i1
    %3 = arith.extui %2 : i1 to i32
    %c0_i32_1 = arith.constant 0 : i32
    %4 = arith.cmpi ne, %3, %c0_i32_1 : i32
    scf.if %4 {
      %cst = arith.constant 0.000000e+00 : f32
      %23 = vector.broadcast %cst : f32 to vector<4x256xf32>
      %c0_17 = arith.constant 0 : index
      %c0_18 = arith.constant 0 : index
      %24 = vector.load %arg7[%c0_17, %c0_18] : memref<4x256xf32, #tpu.memory_space<vmem>>, vector<4x256xf32>
      tpu.vector_store %arg7[%c0_17, %c0_18], %23 {strides = array<i32>} : memref<4x256xf32, #tpu.memory_space<vmem>>, vector<4x256xf32>,
    } else {
    }
    %c0 = arith.constant 0 : index
    %c0_2 = arith.constant 0 : index
    %c0_3 = arith.constant 0 : index
    %5 = vector.load %arg3[%c0, %c0_2, %c0_3] : memref<1x4x256xf32, #tpu.memory_space<vmem>>, vector<1x4x256xf32>
    %6 = vector.shape_cast %5 : vector<1x4x256xf32> to vector<4x256xf32>
    %c0_4 = arith.constant 0 : index
    %c0_5 = arith.constant 0 : index
    %c0_6 = arith.constant 0 : index
    %7 = vector.load %arg4[%c0_4, %c0_5, %c0_6] : memref<1x4x256xf32, #tpu.memory_space<vmem>>, vector<1x4x256xf32>
    %8 = vector.shape_cast %7 : vector<1x4x256xf32> to vector<4x256xf32>
    %9 = arith.subf %6, %8 : vector<4x256xf32>
    %c0_7 = arith.constant 0 : index
    %c0_8 = arith.constant 0 : index
    %c0_9 = arith.constant 0 : index
    %10 = vector.load %arg5[%c0_7, %c0_8, %c0_9] : memref<1x1x256xf32, #tpu.memory_space<vmem>>, vector<1x1x256xf32>
    %11 = vector.shape_cast %10 : vector<1x1x256xf32> to vector<1x256xf32>
    %12 = vector.broadcast %11 : vector<1x256xf32> to vector<4x256xf32>
    %13 = arith.mulf %9, %12 : vector<4x256xf32>
    %c0_10 = arith.constant 0 : index
    %c0_11 = arith.constant 0 : index
    %14 = vector.load %arg7[%c0_10, %c0_11] : memref<4x256xf32, #tpu.memory_space<vmem>>, vector<4x256xf32>
    %15 = arith.mulf %13, %13 : vector<4x256xf32>
    %16 = arith.addf %14, %15 : vector<4x256xf32>
    %c0_12 = arith.constant 0 : index
    %c0_13 = arith.constant 0 : index
    %17 = vector.load %arg7[%c0_12, %c0_13] : memref<4x256xf32, #tpu.memory_space<vmem>>, vector<4x256xf32>
    tpu.vector_store %arg7[%c0_12, %c0_13], %16 {strides = array<i32>} : memref<4x256xf32, #tpu.memory_space<vmem>>, vector<4x256xf32>,
    %c0_i32_14 = arith.constant 0 : i32
    %18 = arith.cmpi eq, %arg1, %c0_i32_14 : i32
    %c0_i32_15 = arith.constant 0 : i32
    %19 = arith.cmpi eq, %arg2, %c0_i32_15 : i32
    %20 = arith.andi %18, %19 : i1
    %21 = arith.extui %20 : i1 to i32
    %c0_i32_16 = arith.constant 0 : i32
    %22 = arith.cmpi ne, %21, %c0_i32_16 : i32
    scf.if %22 {
      %c0_17 = arith.constant 0 : index
      %c0_18 = arith.constant 0 : index
      %23 = vector.load %arg7[%c0_17, %c0_18] : memref<4x256xf32, #tpu.memory_space<vmem>>, vector<4x256xf32>
      %24 = vector.shape_cast %23 : vector<4x256xf32> to vector<1x4x256xf32>
      %cst = arith.constant dense<0.000000e+00> : vector<1xf32>
      %25 = vector.multi_reduction <add>, %24, %cst [1, 2] : vector<1x4x256xf32> to vector<1xf32>
      %26 = vector.shape_cast %25 : vector<1xf32> to vector<1x1x1xf32>
      %27 = vector.extract %26[0, 0, 0] : f32 from vector<1x1x1xf32>
      %28 = vector.broadcast %27 : f32 to vector<1x1x128xf32>
      %c0_19 = arith.constant 0 : index
      %c0_20 = arith.constant 0 : index
      %c0_21 = arith.constant 0 : index
      %29 = vector.load %arg6[%c0_19, %c0_20, %c0_21] : memref<1x1x128xf32, #tpu.memory_space<vmem>>, vector<1x1x128xf32>
      tpu.vector_store %arg6[%c0_19, %c0_20, %c0_21], %28 {strides = array<i32>} : memref<1x1x128xf32, #tpu.memory_space<vmem>>, vector<1x1x128xf32>,
    } else {
    }
    return
  }
  func.func @transform_0(%arg0: i32, %arg1: i32, %arg2: i32) -> (i32, i32, i32) {
    %c0_i32 = arith.constant 0 : i32
    return %arg0, %arg1, %arg2 : i32, i32, i32
  }
  func.func @transform_1(%arg0: i32, %arg1: i32, %arg2: i32) -> (i32, i32, i32) {
    %c0_i32 = arith.constant 0 : i32
    return %arg0, %arg1, %arg2 : i32, i32, i32
  }
  func.func @transform_2(%arg0: i32, %arg1: i32, %arg2: i32) -> (i32, i32, i32) {
    %c0_i32 = arith.constant 0 : i32
    %c0_i32_0 = arith.constant 0 : i32
    return %arg0, %c0_i32, %arg2 : i32, i32, i32
  }
  func.func @transform_3(%arg0: i32, %arg1: i32, %arg2: i32) -> (i32, i32, i32) {
    %c0_i32 = arith.constant 0 : i32
    %c0_i32_0 = arith.constant 0 : i32
    %c0_i32_1 = arith.constant 0 : i32
    return %arg0, %c0_i32, %c0_i32_0 : i32, i32, i32
  }
}

module attributes {stable_mosaic.version = 11 : i64} {
  func.func @_attn_loss_kernel(%arg0: i32, %arg1: i32, %arg2: i32, %arg3: memref<1x4x64xf32, #tpu.memory_space<vmem>>, %arg4: memref<1x4x64xf32, #tpu.memory_space<vmem>>, %arg5: memref<1x1x64xf32, #tpu.memory_space<vmem>>, %arg6: memref<1x1x128xf32, #tpu.memory_space<vmem>>, %arg7: memref<4x64xf32, #tpu.memory_space<vmem>>) attributes {dimension_semantics = [#tpu.dimension_semantics<parallel>, #tpu.dimension_semantics<arbitrary>, #tpu.dimension_semantics<arbitrary>], iteration_bounds = array<i64: 2, 1, 1>, scalar_prefetch = 0 : i64, scratch_operands = 1 : i64, tpu.core_type = #tpu.core_type<tc>, window_params = [{transform_indices = @transform_0, window_bounds = array<i64: 1, 4, 64>}, {transform_indices = @transform_1, window_bounds = array<i64: 1, 4, 64>}, {transform_indices = @transform_2, window_bounds = array<i64: 1, 1, 64>}, {transform_indices = @transform_3, window_bounds = array<i64: 1, 1, 128>}]} {
    %c0_i32 = arith.constant 0 : i32
    %0 = arith.cmpi eq, %arg1, %c0_i32 : i32
    %c0_i32_0 = arith.constant 0 : i32
    %1 = arith.cmpi eq, %arg2, %c0_i32_0 : i32
    %2 = arith.andi %0, %1 : i1
    %3 = arith.extui %2 : i1 to i32
    %c0_i32_1 = arith.constant 0 : i32
    %4 = arith.cmpi ne, %3, %c0_i32_1 : i32
    scf.if %4 {
      %cst = arith.constant 0.000000e+00 : f32
      %23 = vector.broadcast %cst : f32 to vector<4x64xf32>
      %c0_17 = arith.constant 0 : index
      %c0_18 = arith.constant 0 : index
      %24 = vector.load %arg7[%c0_17, %c0_18] : memref<4x64xf32, #tpu.memory_space<vmem>>, vector<4x64xf32>
      tpu.vector_store %arg7[%c0_17, %c0_18], %23 {strides = array<i32>} : memref<4x64xf32, #tpu.memory_space<vmem>>, vector<4x64xf32>,
    } else {
    }
    %c0 = arith.constant 0 : index
    %c0_2 = arith.constant 0 : index
    %c0_3 = arith.constant 0 : index
    %5 = vector.load %arg3[%c0, %c0_2, %c0_3] : memref<1x4x64xf32, #tpu.memory_space<vmem>>, vector<1x4x64xf32>
    %6 = vector.shape_cast %5 : vector<1x4x64xf32> to vector<4x64xf32>
    %c0_4 = arith.constant 0 : index
    %c0_5 = arith.constant 0 : index
    %c0_6 = arith.constant 0 : index
    %7 = vector.load %arg4[%c0_4, %c0_5, %c0_6] : memref<1x4x64xf32, #tpu.memory_space<vmem>>, vector<1x4x64xf32>
    %8 = vector.shape_cast %7 : vector<1x4x64xf32> to vector<4x64xf32>
    %9 = arith.subf %6, %8 : vector<4x64xf32>
    %c0_7 = arith.constant 0 : index
    %c0_8 = arith.constant 0 : index
    %c0_9 = arith.constant 0 : index
    %10 = vector.load %arg5[%c0_7, %c0_8, %c0_9] : memref<1x1x64xf32, #tpu.memory_space<vmem>>, vector<1x1x64xf32>
    %11 = vector.shape_cast %10 : vector<1x1x64xf32> to vector<1x64xf32>
    %12 = vector.broadcast %11 : vector<1x64xf32> to vector<4x64xf32>
    %13 = arith.mulf %9, %12 : vector<4x64xf32>
    %c0_10 = arith.constant 0 : index
    %c0_11 = arith.constant 0 : index
    %14 = vector.load %arg7[%c0_10, %c0_11] : memref<4x64xf32, #tpu.memory_space<vmem>>, vector<4x64xf32>
    %15 = arith.mulf %13, %13 : vector<4x64xf32>
    %16 = arith.addf %14, %15 : vector<4x64xf32>
    %c0_12 = arith.constant 0 : index
    %c0_13 = arith.constant 0 : index
    %17 = vector.load %arg7[%c0_12, %c0_13] : memref<4x64xf32, #tpu.memory_space<vmem>>, vector<4x64xf32>
    tpu.vector_store %arg7[%c0_12, %c0_13], %16 {strides = array<i32>} : memref<4x64xf32, #tpu.memory_space<vmem>>, vector<4x64xf32>,
    %c0_i32_14 = arith.constant 0 : i32
    %18 = arith.cmpi eq, %arg1, %c0_i32_14 : i32
    %c0_i32_15 = arith.constant 0 : i32
    %19 = arith.cmpi eq, %arg2, %c0_i32_15 : i32
    %20 = arith.andi %18, %19 : i1
    %21 = arith.extui %20 : i1 to i32
    %c0_i32_16 = arith.constant 0 : i32
    %22 = arith.cmpi ne, %21, %c0_i32_16 : i32
    scf.if %22 {
      %c0_17 = arith.constant 0 : index
      %c0_18 = arith.constant 0 : index
      %23 = vector.load %arg7[%c0_17, %c0_18] : memref<4x64xf32, #tpu.memory_space<vmem>>, vector<4x64xf32>
      %24 = vector.shape_cast %23 : vector<4x64xf32> to vector<1x4x64xf32>
      %cst = arith.constant dense<0.000000e+00> : vector<1xf32>
      %25 = vector.multi_reduction <add>, %24, %cst [1, 2] : vector<1x4x64xf32> to vector<1xf32>
      %26 = vector.shape_cast %25 : vector<1xf32> to vector<1x1x1xf32>
      %27 = vector.extract %26[0, 0, 0] : f32 from vector<1x1x1xf32>
      %28 = vector.broadcast %27 : f32 to vector<1x1x128xf32>
      %c0_19 = arith.constant 0 : index
      %c0_20 = arith.constant 0 : index
      %c0_21 = arith.constant 0 : index
      %29 = vector.load %arg6[%c0_19, %c0_20, %c0_21] : memref<1x1x128xf32, #tpu.memory_space<vmem>>, vector<1x1x128xf32>
      tpu.vector_store %arg6[%c0_19, %c0_20, %c0_21], %28 {strides = array<i32>} : memref<1x1x128xf32, #tpu.memory_space<vmem>>, vector<1x1x128xf32>,
    } else {
    }
    return
  }
  func.func @transform_0(%arg0: i32, %arg1: i32, %arg2: i32) -> (i32, i32, i32) {
    %c0_i32 = arith.constant 0 : i32
    return %arg0, %arg1, %arg2 : i32, i32, i32
  }
  func.func @transform_1(%arg0: i32, %arg1: i32, %arg2: i32) -> (i32, i32, i32) {
    %c0_i32 = arith.constant 0 : i32
    return %arg0, %arg1, %arg2 : i32, i32, i32
  }
  func.func @transform_2(%arg0: i32, %arg1: i32, %arg2: i32) -> (i32, i32, i32) {
    %c0_i32 = arith.constant 0 : i32
    %c0_i32_0 = arith.constant 0 : i32
    return %arg0, %c0_i32, %arg2 : i32, i32, i32
  }
  func.func @transform_3(%arg0: i32, %arg1: i32, %arg2: i32) -> (i32, i32, i32) {
    %c0_i32 = arith.constant 0 : i32
    %c0_i32_0 = arith.constant 0 : i32
    %c0_i32_1 = arith.constant 0 : i32
    return %arg0, %c0_i32, %c0_i32_0 : i32, i32, i32
  }
}

</mosaic_0001>

<bundles_post_ra>
// kernel: transferal_perceptual_loss.5
= control target key start
LH: loop header
LB: loop body
LE: loop exit
PB: predicated region body
PF: predicated region fallthrough
CT: control target
= control target key end

     0   :  { %s621_s12 = smov 0   ;;  %s623_s13 = smov 0   ;;  %s673_s0 = inlined_call_operand.vmem [shape: f32[2,4,1024], index: 0, kind: input, shape index: {}]   ;;  %s674_s1 = inlined_call_operand.vmem [shape: f32[2,4,1024], index: 1, kind: input, shape index: {}]   ;;  %s675_s2 = inlined_call_operand.vmem [shape: f32[2,1,1024], index: 2, kind: input, shape index: {}]   ;;  %s676_s3 = inlined_call_operand.vmem [shape: f32[2,1,128], index: 3, kind: output, shape index: {}]  }
   0x1   :  { %s625_s14 = smov 0  }
   0x2 LB: > { %s32_s15 = sadd.s32 1, %s595_s13  ;;  %p541_p0 = scmp.ge.s32.totalorder %s599_s14, 1  ;;  %s599_s14 = sphi %s625_s14, %s13_s14   ;;  %s595_s13 = sphi %s623_s13, %s678_s13   ;;  %s591_s12 = sphi %s621_s12, %s677_s12  }
   0x3   : > { %p34_p1 = scmp.ge.s32.totalorder %s32_s15, 2  ;;  %p208_p2 = scmp.lt.s32.totalorder %s599_s14, 3 }
   0x5   : > { %s680_s15 = smov (%p34_p1, %s32_s15), 0  ;;  %p209_p3 = pnand %p541_p0, %p208_p2 }
   0x6   : > { %p260_p4 = scmp.lt.s32.totalorder (!%p209_p3), %s591_s12, 1  ;;  %v323_v0 = vlaneseq (!%p209_p3)  ;;  %vm401_vm0 = vcmask (!%p209_p3), 1043456  }
   0x7   : > { %212 = sbr.rel (%p209_p3) target bundleno = 251 (0xfb), region = 32 }
   0x8   : > { %v324_v1 = vshrl.u32 (!%p209_p3), %v323_v0, 7 }
   0xa   : > { %v325_v2 = vsub.s32 (!%p209_p3), 0, %v324_v1  ;;  %v329_v3 = vsub.s32 (!%p209_p3), 1, %v324_v1  ;;  %v333_v4 = vsub.s32 (!%p209_p3), 2, %v324_v1  ;;  %v337_v8 = vsub.s32 (!%p209_p3), 3, %v324_v1 }
   0xb   : > { %v341_v9 = vsub.s32 (!%p209_p3), 4, %v324_v1  ;;  %v345_v10 = vsub.s32 (!%p209_p3), 5, %v324_v1  ;;  %v349_v13 = vsub.s32 (!%p209_p3), 6, %v324_v1  ;;  %v353_v14 = vsub.s32 (!%p209_p3), 7, %v324_v1 }
   0xe   : > { %s682_s12 = smov (!%p260_p4, %s591_s12), 1 }
   0xf   : > { %s549_s16 = sshll.u32 %s682_s12, 5  ;;  %s546_s17 = sshll.u32 %s682_s12, 3 }
  0x10   : > { %s271_s20 = scalar_lea.vmem %s673_s0, %s549_s16  ;;  %s285_s23 = scalar_lea.vmem %s674_s1, %s549_s16 }
  0x11   : > { %s294_s26 = scalar_lea.vmem %s675_s2, %s546_s17  ;;  %v309_v5 = vld [vmem:[%s271_s20] sm:$0xff]  ;;  %v310_v6 = vld [vmem:[%s271_s20 + $0x8] sm:$0xff]  ;;  %v311_v7 = vld [vmem:[%s271_s20 + $0x10] sm:$0xff]  ;;  %s298_s29 = scalar_lea.vmem %s676_s3, %s682_s12 }
  0x12   : > { %v313_v11 = vld [vmem:[%s285_s23] sm:$0xff]  ;;  %v314_v12 = vld [vmem:[%s285_s23 + $0x8] sm:$0xff]  ;;  %v315_v15 = vld [vmem:[%s285_s23 + $0x10] sm:$0xff] }
  0x13   : > { %v317_v16 = vsub.f32 %v309_v5, %v313_v11  ;;  %v321_v17 = vld [vmem:[%s294_s26] sm:$0xff]  ;;  %v318_v18 = vsub.f32 %v310_v6, %v314_v12  ;;  %v319_v19 = vsub.f32 %v311_v7, %v315_v15  ;;  %v312_v22 = vld [vmem:[%s271_s20 + $0x18] sm:$0xff] }
  0x14   : > { %v326_v20 = vrot.slane %v321_v17, %v325_v2  ;;  %v330_v21 = vrot.slane %v321_v17, %v329_v3  ;;  %v316_v23 = vld [vmem:[%s285_s23 + $0x18] sm:$0xff]  ;;  %v334_v24 = vrot.slane %v321_v17, %v333_v4  ;;  %v338_v25 = vrot.slane %v321_v17, %v337_v8 }
  0x15   : > { %v342_v26 = vrot.slane %v321_v17, %v341_v9  ;;  %v346_v27 = vrot.slane %v321_v17, %v345_v10  ;;  %v350_v28 = vrot.slane %v321_v17, %v349_v13  ;;  %v354_v29 = vrot.slane %v321_v17, %v353_v14 }
  0x16   : > { %v355_v30 = vcombine.low %v326_v20, %v330_v21  ;;  %v356_v31 = vcombine.low %v334_v24, %v338_v25  ;;  %v320_v33 = vsub.f32 %v312_v22, %v316_v23 }
  0x17   : > { %v357_v32 = vcombine.low %v342_v26, %v346_v27  ;;  %v358_v34 = vcombine.low %v350_v28, %v354_v29 }
  0x18   : > { %v363_v35 = vmul.f32 %v355_v30, %v317_v16  ;;  %v364_v36 = vmul.f32 %v356_v31, %v318_v18 }
  0x19   : > { %v365_v37 = vmul.f32 %v357_v32, %v319_v19  ;;  %v366_v40 = vmul.f32 %v358_v34, %v320_v33 }
  0x1a   : > { %v371_v38 = vmul.f32 %v363_v35, %v363_v35  ;;  %v372_v39 = vmul.f32 %v364_v36, %v364_v36 }
  0x1b   : > { %v373_v41 = vmul.f32 %v365_v37, %v365_v37  ;;  %v374_v48 = vmul.f32 %v366_v40, %v366_v40 }
  0x1c   : > { %v393_v42 = vcombine.high %v371_v38, %v371_v38  ;;  %v402_v43 = vsel %vm401_vm0, %v371_v38, 0.0  ;;  %v394_v44 = vcombine.high %v372_v39, %v372_v39  ;;  %v405_v46 = vsel %vm401_vm0, %v372_v39, 0.0 }
  0x1d   : > { %v395_v49 = vcombine.high %v373_v41, %v373_v41  ;;  %v409_v52 = vsel %vm401_vm0, %v373_v41, 0.0  ;;  %v396_v54 = vcombine.high %v374_v48, %v374_v48  ;;  %v413_v57 = vsel %vm401_vm0, %v374_v48, 0.0 }
  0x1e   : > { %v403_v45 = vsel %vm401_vm0, %v393_v42, 0.0  ;;  %v407_v50 = vsel %vm401_vm0, %v394_v44, 0.0 }
  0x1f   : > { %v404_v47 = vadd.f32 %v403_v45, %v402_v43  ;;  %v411_v55 = vsel %vm401_vm0, %v395_v49, 0.0  ;;  %v415_v59 = vsel %vm401_vm0, %v396_v54, 0.0 }
  0x21   : > { %v406_v51 = vadd.f32 %v405_v46, %v404_v47 }
  0x23   : > { %v408_v53 = vadd.f32 %v407_v50, %v406_v51 }
  0x25   : > { %v410_v56 = vadd.f32 %v409_v52, %v408_v53 }
  0x27   : > { %v412_v58 = vadd.f32 %v411_v55, %v410_v56 }
  0x29   : > { %v414_v60 = vadd.f32 %v413_v57, %v412_v58 }
  0x2b   : > { %v416_v61 = vadd.f32 %v415_v59, %v414_v60 }
  0x2d   : > { %417 = vadd.xlane.f32.xlu0 %v416_v61 }
  0xba   : > { %v418_v62 = vpop.xlane.xlu0 %417 }
  0xbb   : > { %v419_v63 = vrot.slane %v418_v62, 4 }
  0xbd   : > { %v420_v0 = vadd.f32 %v419_v63, %v418_v62 }
  0xbf   : > { %v421_v1 = vrot.slane %v420_v0, 2 }
  0xc1   : > { %v422_v2 = vadd.f32 %v421_v1, %v420_v0 }
  0xc3   : > { %v423_v3 = vrot.slane %v422_v2, 1 }
  0xc5   : > { %v424_v4 = vadd.f32 %v423_v3, %v422_v2 }
  0xc7   : > { %551 = vpush %v424_v4 }
  0xf8   : > { %s552_s30 = spop %551 }
  0xf9   : > { %v426_v5 = vstv %s552_s30 }
  0xfa   : > { %427 = vst [vmem:[%s298_s29] sm:$0x1] %v426_v5 }
  0xfb PF: > { %s13_s14 = sadd.s32 1, %s599_s14   ;;  %s677_s12 = smov %s595_s13 }
  0xfc   : > { %p10_p5 = scmp.ge.s32.totalorder %s13_s14, 4   ;;  %s678_s13 = smov %s680_s15 }
  0xfe   :  { %12 = sbr.rel (!%p10_p5) target bundleno = 2 (0x2), region = 76 }

// kernel: transferal_perceptual_loss.3
= control target key start
LH: loop header
LB: loop body
LE: loop exit
PB: predicated region body
PF: predicated region fallthrough
CT: control target
= control target key end

     0   :  { %s484_s12 = smov 0   ;;  %s486_s13 = smov 0   ;;  %s526_s0 = inlined_call_operand.vmem [shape: f32[2,4,64], index: 0, kind: input, shape index: {}]   ;;  %s527_s1 = inlined_call_operand.vmem [shape: f32[2,4,64], index: 1, kind: input, shape index: {}]   ;;  %s528_s2 = inlined_call_operand.vmem [shape: f32[2,1,64], index: 2, kind: input, shape index: {}]   ;;  %s529_s3 = inlined_call_operand.vmem [shape: f32[2,1,128], index: 3, kind: output, shape index: {}]  }
   0x1   :  { %s488_s14 = smov 0  }
   0x2 LB: > { %s32_s15 = sadd.s32 1, %s457_s13  ;;  %p406_p0 = scmp.ge.s32.totalorder %s461_s14, 1  ;;  %s461_s14 = sphi %s488_s14, %s13_s14   ;;  %s457_s13 = sphi %s486_s13, %s531_s13   ;;  %s453_s12 = sphi %s484_s12, %s530_s12  }
   0x3   : > { %p34_p1 = scmp.ge.s32.totalorder %s32_s15, 2  ;;  %p197_p2 = scmp.lt.s32.totalorder %s461_s14, 3 }
   0x5   : > { %s533_s15 = smov (%p34_p1, %s32_s15), 0  ;;  %p198_p3 = pnand %p406_p0, %p197_p2 }
   0x6   : > { %p240_p4 = scmp.lt.s32.totalorder (!%p198_p3), %s453_s12, 1  ;;  %vm275_vm0 = vcmask (!%p198_p3), 519168   ;;  %v463_v0 = vmov (!%p198_p3), 0.0  }
   0x7   : > { %201 = sbr.rel (%p198_p3) target bundleno = 242 (0xf2), region = 32  ;;  %276 = vst.msk [vmem:[#allocation2] sm:$0xf] (!%p198_p3), %vm275_vm0, %v463_v0 }
   0xe   : > { %s535_s12 = smov (!%p240_p4, %s453_s12), 1  ;;  %v288_v6 = vld [vmem:[#allocation2] sm:$0xf] }
   0xf   : > { %s407_s16 = sshll.u32 %s535_s12, 2  ;;  %s265_s19 = scalar_lea.vmem %s528_s2, %s535_s12 }
  0x10   : > { %s249_s22 = scalar_lea.vmem %s526_s0, %s407_s16  ;;  %s259_s25 = scalar_lea.vmem %s527_s1, %s407_s16  ;;  %v409_v3 = vld [vmem:[%s265_s19] ss:$0 sm:$0xff] }
  0x11   : > { %v277_v1 = vld [vmem:[%s249_s22] sm:$0xf]  ;;  %s268_s28 = scalar_lea.vmem %s529_s3, %s535_s12 }
  0x12   : > { %v278_v2 = vld [vmem:[%s259_s25] sm:$0xf] }
  0x13   : > { %v279_v4 = vsub.f32 %v277_v1, %v278_v2 }
  0x15   : > { %v287_v5 = vmul.f32 %v409_v3, %v279_v4 }
  0x17   : > { %v289_v7 = vmul.f32 %v287_v5, %v287_v5 }
  0x19   : > { %v290_v8 = vadd.f32 %v289_v7, %v288_v6 }
  0x1b   : > { %292 = vst.msk [vmem:[#allocation2] sm:$0xf] %vm275_vm0, %v290_v8 }
  0x22   : > { %v295_v9 = vld [vmem:[#allocation2] sm:$0xf] }
  0x23   : > { %v296_v10 = vsel %vm275_vm0, %v295_v9, 0.0 }
  0x24   : > { %297 = vadd.xlane.f32.xlu0 %v296_v10 }
  0xb1   : > { %v298_v11 = vpop.xlane.xlu0 %297 }
  0xb2   : > { %v299_v12 = vrot.slane %v298_v11, 4 }
  0xb4   : > { %v300_v13 = vadd.f32 %v299_v12, %v298_v11 }
  0xb6   : > { %v301_v14 = vrot.slane %v300_v13, 2 }
  0xb8   : > { %v302_v15 = vadd.f32 %v301_v14, %v300_v13 }
  0xba   : > { %v303_v16 = vrot.slane %v302_v15, 1 }
  0xbc   : > { %v304_v17 = vadd.f32 %v303_v16, %v302_v15 }
  0xbe   : > { %412 = vpush %v304_v17 }
  0xef   : > { %s413_s29 = spop %412 }
  0xf0   : > { %v306_v18 = vstv %s413_s29 }
  0xf1   : > { %307 = vst [vmem:[%s268_s28] sm:$0x1] %v306_v18 }
  0xf2 PF: > { %s13_s14 = sadd.s32 1, %s461_s14   ;;  %s530_s12 = smov %s457_s13 }
  0xf3   : > { %p10_p5 = scmp.ge.s32.totalorder %s13_s14, 4   ;;  %s531_s13 = smov %s533_s15 }
  0xf5   :  { %12 = sbr.rel (!%p10_p5) target bundleno = 2 (0x2), region = 76 }

// kernel: transferal_perceptual_loss.4
= control target key start
LH: loop header
LB: loop body
LE: loop exit
PB: predicated region body
PF: predicated region fallthrough
CT: control target
= control target key end

     0   :  { %s540_s12 = smov 0   ;;  %s542_s13 = smov 0   ;;  %s584_s0 = inlined_call_operand.vmem [shape: f32[2,4,256], index: 0, kind: input, shape index: {}]   ;;  %s585_s1 = inlined_call_operand.vmem [shape: f32[2,4,256], index: 1, kind: input, shape index: {}]   ;;  %s586_s2 = inlined_call_operand.vmem [shape: f32[2,1,256], index: 2, kind: input, shape index: {}]   ;;  %s587_s3 = inlined_call_operand.vmem [shape: f32[2,1,128], index: 3, kind: output, shape index: {}]  }
   0x1   :  { %s544_s14 = smov 0  }
   0x2 LB: > { %s32_s15 = sadd.s32 1, %s514_s13  ;;  %p460_p0 = scmp.ge.s32.totalorder %s518_s14, 1  ;;  %s518_s14 = sphi %s544_s14, %s13_s14   ;;  %s514_s13 = sphi %s542_s13, %s589_s13   ;;  %s510_s12 = sphi %s540_s12, %s588_s12  }
   0x3   : > { %p34_p1 = scmp.ge.s32.totalorder %s32_s15, 2  ;;  %p208_p2 = scmp.lt.s32.totalorder %s518_s14, 3 }
   0x5   : > { %s591_s15 = smov (%p34_p1, %s32_s15), 0  ;;  %p209_p3 = pnand %p460_p0, %p208_p2 }
   0x6   : > { %p260_p4 = scmp.lt.s32.totalorder (!%p209_p3), %s510_s12, 1  ;;  %v311_v0 = vlaneseq (!%p209_p3)  ;;  %vm332_vm0 = vcmask (!%p209_p3), 1043456  }
   0x7   : > { %212 = sbr.rel (%p209_p3) target bundleno = 239 (0xef), region = 32 }
   0x8   : > { %v312_v1 = vshrl.u32 (!%p209_p3), %v311_v0, 7 }
   0xa   : > { %v313_v2 = vsub.s32 (!%p209_p3), 0, %v312_v1  ;;  %v317_v3 = vsub.s32 (!%p209_p3), 1, %v312_v1 }
   0xe   : > { %s593_s12 = smov (!%p260_p4, %s510_s12), 1 }
   0xf   : > { %s468_s16 = sshll.u32 %s593_s12, 3  ;;  %s465_s17 = sshll.u32 %s593_s12, 1 }
  0x10   : > { %s271_s20 = scalar_lea.vmem %s584_s0, %s468_s16  ;;  %s285_s23 = scalar_lea.vmem %s585_s1, %s468_s16 }
  0x11   : > { %s294_s26 = scalar_lea.vmem %s586_s2, %s465_s17  ;;  %v306_v4 = vld [vmem:[%s271_s20] sm:$0xff]  ;;  %s298_s29 = scalar_lea.vmem %s587_s3, %s593_s12 }
  0x12   : > { %v307_v5 = vld [vmem:[%s285_s23] sm:$0xff] }
  0x13   : > { %v309_v6 = vld [vmem:[%s294_s26] sm:$0x3]  ;;  %v308_v7 = vsub.f32 %v306_v4, %v307_v5 }
  0x14   : > { %v314_v8 = vrot.slane %v309_v6, %v313_v2  ;;  %v318_v9 = vrot.slane %v309_v6, %v317_v3 }
  0x16   : > { %v319_v10 = vcombine.low %v314_v8, %v318_v9 }
  0x18   : > { %v321_v11 = vmul.f32 %v319_v10, %v308_v7 }
  0x1a   : > { %v323_v12 = vmul.f32 %v321_v11, %v321_v11 }
  0x1c   : > { %v330_v13 = vcombine.high %v323_v12, %v323_v12  ;;  %v333_v14 = vsel %vm332_vm0, %v323_v12, 0.0 }
  0x1e   : > { %v334_v15 = vsel %vm332_vm0, %v330_v13, 0.0 }
  0x1f   : > { %v335_v16 = vadd.f32 %v334_v15, %v333_v14 }
  0x21   : > { %336 = vadd.xlane.f32.xlu0 %v335_v16 }
  0xae   : > { %v337_v17 = vpop.xlane.xlu0 %336 }
  0xaf   : > { %v338_v18 = vrot.slane %v337_v17, 4 }
  0xb1   : > { %v339_v19 = vadd.f32 %v338_v18, %v337_v17 }
  0xb3   : > { %v340_v20 = vrot.slane %v339_v19, 2 }
  0xb5   : > { %v341_v21 = vadd.f32 %v340_v20, %v339_v19 }
  0xb7   : > { %v342_v22 = vrot.slane %v341_v21, 1 }
  0xb9   : > { %v343_v23 = vadd.f32 %v342_v22, %v341_v21 }
  0xbb   : > { %470 = vpush %v343_v23 }
  0xec   : > { %s471_s30 = spop %470 }
  0xed   : > { %v345_v24 = vstv %s471_s30 }
  0xee   : > { %346 = vst [vmem:[%s298_s29] sm:$0x1] %v345_v24 }
  0xef PF: > { %s13_s14 = sadd.s32 1, %s518_s14   ;;  %s588_s12 = smov %s514_s13 }
  0xf0   : > { %p10_p5 = scmp.ge.s32.totalorder %s13_s14, 4   ;;  %s589_s13 = smov %s591_s15 }
  0xf2   :  { %12 = sbr.rel (!%p10_p5) target bundleno = 2 (0x2), region = 76 }

</bundles_post_ra>
